<compile_context>
chip_gen: v6e
topology: v6e:2x2x1
jax: 0.10.0
libtpu: 0.0.40
codegen_flags: <defaults>
</compile_context>

<pallas_src>
import functools

import numpy as np
import jax
import jax.numpy as jnp
from jax.experimental import pallas as pl
from jax.experimental.pallas import tpu as pltpu


def _round_up(x, m):
    return (x + m - 1) // m * m


def _smearing_kernel(start, stop, dist_ref, off_ref, coeff_ref, out_ref):
    # dist_ref:  (TILE_E, 1)   row tile of distances (rows -> sublanes)
    # off_ref:   (1, G)        Gaussian centers (resident, lane-broadcast)
    # coeff_ref: (1, G)        -0.5 / width^2   (resident, lane-broadcast)
    # out_ref:   (TILE_E, G)
    d = jnp.clip(dist_ref[...], start, stop)            # clamp_min(start).clamp_max(stop)
    diff = d - off_ref[...]                              # broadcast to (TILE_E, G)
    out_ref[...] = jnp.exp(coeff_ref[...] * diff * diff).astype(out_ref.dtype)


class GaussianSmearingPallas:
    """Pallas TPU port of the PyTorch GaussianSmearing module."""

    def __init__(self, start=0.0, stop=10.0, num_gaussians=50, type_='exp',
                 max_tile_rows=4096, out_dtype=jnp.float32):
        self.start = float(start)
        self.stop = float(stop)
        self.num_gaussians = int(num_gaussians)
        assert max_tile_rows % 8 == 0, "row tile must be a multiple of the sublane count"
        self.max_tile_rows = int(max_tile_rows)
        self.out_dtype = out_dtype

        # Buffers, exactly as in the PyTorch __init__.
        if type_ == 'exp':
            offset = np.exp(np.linspace(np.log(self.start + 1.0),
                                        np.log(self.stop + 1.0),
                                        self.num_gaussians)) - 1.0
        elif type_ == 'linear':
            offset = np.linspace(self.start, self.stop, self.num_gaussians)
        else:
            raise NotImplementedError('type_ must be either exp or linear')
        diff = np.diff(offset)
        diff = np.concatenate([diff[:1], diff])
        coeff = -0.5 / diff ** 2
        self.offset = jnp.asarray(offset, jnp.float32).reshape(1, -1)
        self.coeff = jnp.asarray(coeff, jnp.float32).reshape(1, -1)

        self._jit_forward = jax.jit(self._forward)

    def _choose_tile(self, n_rows):
        # Multiple of 8 sublanes; cap at ~E/2 so there are >= 2 grid steps
        # whenever E > 8 (lets the "parallel" axis use both v7x TensorCores).
        if n_rows <= 8:
            return 8
        half = _round_up(-(-n_rows // 2), 8)
        return max(min(self.max_tile_rows, half), 8)

    def _forward(self, dist):
        # PyTorch does dist.view(-1, 1): accept any input shape, flatten rows.
        dist = jnp.reshape(dist.astype(jnp.float32), (-1, 1))
        E = dist.shape[0]
        G = self.num_gaussians
        if E == 0:
            return jnp.zeros((0, G), self.out_dtype)
        tile = self._choose_tile(E)

        kernel = functools.partial(_smearing_kernel, self.start, self.stop)
        return pl.pallas_call(
            kernel,
            out_shape=jax.ShapeDtypeStruct((E, G), self.out_dtype),
            grid=(pl.cdiv(E, tile),),
            in_specs=[
                pl.BlockSpec((tile, 1), lambda i: (i, 0)),   # distances, row-tiled
                pl.BlockSpec((1, G), lambda i: (0, 0)),      # offset (resident)
                pl.BlockSpec((1, G), lambda i: (0, 0)),      # coeff  (resident)
            ],
            out_specs=pl.BlockSpec((tile, G), lambda i: (i, 0)),
            compiler_params=pltpu.CompilerParams(
                dimension_semantics=("parallel",),           # shard rows across TCs (v7x)
                vmem_limit_bytes=32 * 1024 * 1024,           # safe on v5e/v6e/v7x
            ),
        )(dist, self.offset, self.coeff)

    def __call__(self, dist):
        return self._jit_forward(dist)


if __name__ == "__main__":
    key = jax.random.PRNGKey(0)
    E = 777                                   # non-multiple of the tile -> partial last block
    num_gaussians = 50
    start, stop = 0.0, 10.0

    dist = jax.random.uniform(key, (E,), dtype=jnp.float32, minval=0.0, maxval=12.0)

    module = GaussianSmearingPallas(start=start, stop=stop,
                                    num_gaussians=num_gaussians, type_='exp')
    out = jax.block_until_ready(module(dist))

    # Pure-JAX reference (mirrors the PyTorch forward exactly).
    d_ref = jnp.clip(dist, start, stop).reshape(-1, 1)
    ref = jnp.exp(module.coeff * (d_ref - module.offset) ** 2)

    assert out.shape == (E, num_gaussians)
    assert bool(jnp.all(jnp.isfinite(out)))
    assert bool(jnp.allclose(out, ref, atol=1e-6, rtol=1e-6))

    # Small-E path (tile capped at 8, grid of 2, partial last block).
    small = jax.random.uniform(jax.random.PRNGKey(1), (16,), dtype=jnp.float32,
                               minval=0.0, maxval=12.0)
    out_small = jax.block_until_ready(module(small))
    ref_small = jnp.exp(module.coeff *
                        (jnp.clip(small, start, stop).reshape(-1, 1) - module.offset) ** 2)
    assert out_small.shape == (16, num_gaussians)
    assert bool(jnp.allclose(out_small, ref_small, atol=1e-6, rtol=1e-6))

    print("KERNEL_OK")
</pallas_src>

<mosaic_0001>
module attributes {stable_mosaic.version = 11 : i64} {
  func.func @_smearing_kernel(%arg0: i32, %arg1: memref<392x1xf32, #tpu.memory_space<vmem>>, %arg2: memref<1x50xf32, #tpu.memory_space<vmem>>, %arg3: memref<1x50xf32, #tpu.memory_space<vmem>>, %arg4: memref<392x50xf32, #tpu.memory_space<vmem>>) attributes {dimension_semantics = [#tpu.dimension_semantics<parallel>], iteration_bounds = array<i64: 2>, scalar_prefetch = 0 : i64, scratch_operands = 0 : i64, tpu.core_type = #tpu.core_type<tc>, window_params = [{transform_indices = @transform_0, window_bounds = array<i64: 392, 1>}, {pipeline_mode = #tpu.pipeline_mode<synchronous>, transform_indices = @transform_1, window_bounds = array<i64: 1, 50>}, {pipeline_mode = #tpu.pipeline_mode<synchronous>, transform_indices = @transform_2, window_bounds = array<i64: 1, 50>}, {transform_indices = @transform_3, window_bounds = array<i64: 392, 50>}]} {
    %c0 = arith.constant 0 : index
    %c0_0 = arith.constant 0 : index
    %0 = vector.load %arg1[%c0, %c0_0] : memref<392x1xf32, #tpu.memory_space<vmem>>, vector<392x1xf32>
    %cst = arith.constant 0.000000e+00 : f32
    %cst_1 = arith.constant 1.000000e+01 : f32
    %1 = vector.broadcast %cst : f32 to vector<392x1xf32>
    %2 = arith.maximumf %1, %0 : vector<392x1xf32>
    %3 = vector.broadcast %cst_1 : f32 to vector<392x1xf32>
    %4 = arith.minimumf %3, %2 : vector<392x1xf32>
    %c0_2 = arith.constant 0 : index
    %c0_3 = arith.constant 0 : index
    %5 = vector.load %arg2[%c0_2, %c0_3] : memref<1x50xf32, #tpu.memory_space<vmem>>, vector<1x50xf32>
    %6 = vector.broadcast %4 : vector<392x1xf32> to vector<392x50xf32>
    %7 = vector.broadcast %5 : vector<1x50xf32> to vector<392x50xf32>
    %8 = arith.subf %6, %7 : vector<392x50xf32>
    %c0_4 = arith.constant 0 : index
    %c0_5 = arith.constant 0 : index
    %9 = vector.load %arg3[%c0_4, %c0_5] : memref<1x50xf32, #tpu.memory_space<vmem>>, vector<1x50xf32>
    %10 = vector.broadcast %9 : vector<1x50xf32> to vector<392x50xf32>
    %11 = arith.mulf %10, %8 : vector<392x50xf32>
    %12 = arith.mulf %11, %8 : vector<392x50xf32>
    %13 = math.exp %12 : vector<392x50xf32>
    %c0_6 = arith.constant 0 : index
    %c0_7 = arith.constant 0 : index
    %14 = vector.load %arg4[%c0_6, %c0_7] : memref<392x50xf32, #tpu.memory_space<vmem>>, vector<392x50xf32>
    tpu.vector_store %arg4[%c0_6, %c0_7], %13 {strides = array<i32>} : memref<392x50xf32, #tpu.memory_space<vmem>>, vector<392x50xf32>,
    return
  }
  func.func @transform_0(%arg0: i32) -> (i32, i32) {
    %c0_i32 = arith.constant 0 : i32
    %c0_i32_0 = arith.constant 0 : i32
    return %arg0, %c0_i32 : i32, i32
  }
  func.func @transform_1(%arg0: i32) -> (i32, i32) {
    %c0_i32 = arith.constant 0 : i32
    %c0_i32_0 = arith.constant 0 : i32
    %c0_i32_1 = arith.constant 0 : i32
    return %c0_i32, %c0_i32_0 : i32, i32
  }
  func.func @transform_2(%arg0: i32) -> (i32, i32) {
    %c0_i32 = arith.constant 0 : i32
    %c0_i32_0 = arith.constant 0 : i32
    %c0_i32_1 = arith.constant 0 : i32
    return %c0_i32, %c0_i32_0 : i32, i32
  }
  func.func @transform_3(%arg0: i32) -> (i32, i32) {
    %c0_i32 = arith.constant 0 : i32
    %c0_i32_0 = arith.constant 0 : i32
    return %arg0, %c0_i32 : i32, i32
  }
}

</mosaic_0001>

<bundles_post_ra>
// kernel: _forward.1
= control target key start
LH: loop header
LB: loop body
LE: loop exit
PB: predicated region body
PF: predicated region fallthrough
CT: control target
= control target key end

     0   :  { %s1080_s12 = smov 0   ;;  %s1363_s0 = inlined_call_operand.vmem [shape: f32[777,1], index: 0, kind: input, shape index: {}]   ;;  %s1364_s1 = inlined_call_operand.vmem [shape: f32[1,50], index: 1, kind: input, shape index: {}]   ;;  %s1365_s2 = inlined_call_operand.vmem [shape: f32[1,50], index: 2, kind: input, shape index: {}]   ;;  %s1366_s3 = inlined_call_operand.vmem [shape: f32[777,50], index: 3, kind: output, shape index: {}]  }
   0x1 LB: > { %s931_s13 = sadd.s32 4294967295, %s1057_s12   ;;  %p935_p0 = scmp.ge.s32.totalorder %s1057_s12, 1  ;;  %s1057_s12 = sphi %s1080_s12, %s13_s12  }
   0x2   : > { %p138_p1 = scmp.lt.s32.totalorder %s1057_s12, 3 }
   0x4   : > { %p139_p2 = pnand %p935_p0, %p138_p1 }
   0x5   : > { %s162_s14 = smul.u32 (!%p139_p2), 49, %s931_s13 }
   0x6   : > { %142 = sbr.rel (%p139_p2) target bundleno = 262 (0x106), region = 32 }
   0x7   : > { %p163_p3 = scmp.lt.s32.totalorder (!%p139_p2), %s162_s14, 97 }
   0xb   : > { %v1059_v0 = vmov 0   ;;  %s1368_s14 = smov (!%p163_p3, %s162_s14), 97  ;;  %vm825_vm0 = vcmask 408576  }
   0xc   : > { %952 = vset.pattern.permute.xlu1 %v1059_v0  ;;  %951 = vset.pattern.permute.xlu0 %v1059_v0  ;;  %s936_s15 = sshll.u32 %s1368_s14, 3 }
   0xd   : > { %s1096_s18 = scalar_lea.vmem %s1363_s0, %s936_s15  ;;  %s1182_s25 = scalar_lea.vmem %s1366_s3, %s936_s15 }
   0xe   : > { %v176_v1 = vld [vmem:[%s1096_s18 + $0x10] sm:$0xff]  ;;  %v174_v2 = vld [vmem:[%s1096_s18] sm:$0xff]  ;;  %v177_v3 = vld [vmem:[%s1096_s18 + $0x18] sm:$0xff] }
   0xf   : > { %v225_v4 = vmax.f32 %v176_v1, 0.0  ;;  %v223_v5 = vmax.f32 %v174_v2, 0.0  ;;  %v226_v6 = vmax.f32 %v177_v3, 0.0  ;;  %v175_v7 = vld [vmem:[%s1096_s18 + $0x8] sm:$0xff]  ;;  %v178_v10 = vld [vmem:[%s1096_s18 + $0x20] sm:$0xff]  ;;  %v181_v17 = vld [vmem:[%s1096_s18 + $0x38] sm:$0xff] }
  0x10   : > { %v224_v8 = vmax.f32 %v175_v7, 0.0  ;;  %v179_v9 = vld [vmem:[%s1096_s18 + $0x28] sm:$0xff]  ;;  %v227_v16 = vmax.f32 %v178_v10, 0.0  ;;  %v180_v18 = vld [vmem:[%s1096_s18 + $0x30] sm:$0xff]  ;;  %v230_v21 = vmax.f32 %v181_v17, 0.0  ;;  %v182_v24 = vld [vmem:[%s1096_s18 + $0x40] sm:$0xff] }
  0x11   : > { %v274_v11 = vmin.f32 %v225_v4, 10.0  ;;  %v272_v12 = vmin.f32 %v223_v5, 10.0  ;;  %v275_v13 = vmin.f32 %v226_v6, 10.0  ;;  %v228_v15 = vmax.f32 %v179_v9, 0.0  ;;  %v183_v23 = vld [vmem:[%s1096_s18 + $0x48] sm:$0xff]  ;;  %v185_v29 = vld [vmem:[%s1096_s18 + $0x58] sm:$0xff] }
  0x12   : > { %v273_v14 = vmin.f32 %v224_v8, 10.0  ;;  %v276_v20 = vmin.f32 %v227_v16, 10.0  ;;  %v229_v22 = vmax.f32 %v180_v18, 0.0  ;;  %v279_v25 = vmin.f32 %v230_v21, 10.0  ;;  %v184_v30 = vld [vmem:[%s1096_s18 + $0x50] sm:$0xff]  ;;  %v187_v35 = vld [vmem:[%s1096_s18 + $0x68] sm:$0xff] }
  0x13   : > { %334 = vperm.xlu1 %952, %v274_v11   ;;  %324 = vperm.xlu0 %951, %v272_v12   ;;  %v277_v19 = vmin.f32 %v228_v15, 10.0  ;;  %v232_v27 = vmax.f32 %v183_v23, 0.0  ;;  %v231_v28 = vmax.f32 %v182_v24, 0.0  ;;  %v234_v33 = vmax.f32 %v185_v29, 0.0  ;;  %v186_v36 = vld [vmem:[%s1096_s18 + $0x60] sm:$0xff]  ;;  %v189_v41 = vld [vmem:[%s1096_s18 + $0x78] sm:$0xff] }
  0x14   : > { %v278_v26 = vmin.f32 %v229_v22, 10.0  ;;  %v233_v34 = vmax.f32 %v184_v30, 0.0  ;;  %v236_v39 = vmax.f32 %v187_v35, 0.0  ;;  %v235_v40 = vmax.f32 %v186_v36, 0.0  ;;  %v188_v42 = vld [vmem:[%s1096_s18 + $0x70] sm:$0xff]  ;;  %v191_v47 = vld [vmem:[%s1096_s18 + $0x88] sm:$0xff] }
  0x15   : > { %v281_v31 = vmin.f32 %v232_v27, 10.0  ;;  %v280_v32 = vmin.f32 %v231_v28, 10.0  ;;  %v283_v37 = vmin.f32 %v234_v33, 10.0  ;;  %v238_v45 = vmax.f32 %v189_v41, 0.0  ;;  %v190_v48 = vld [vmem:[%s1096_s18 + $0x80] sm:$0xff]  ;;  %v193_v53 = vld [vmem:[%s1096_s18 + $0x98] sm:$0xff] }
  0x16   : > { %v282_v38 = vmin.f32 %v233_v34, 10.0  ;;  %v285_v43 = vmin.f32 %v236_v39, 10.0  ;;  %v284_v44 = vmin.f32 %v235_v40, 10.0  ;;  %v237_v46 = vmax.f32 %v188_v42, 0.0  ;;  %v192_v54 = vld [vmem:[%s1096_s18 + $0x90] sm:$0xff]  ;;  %v195_v59 = vld [vmem:[%s1096_s18 + $0xa8] sm:$0xff] }
  0x17   : > { %339 = vperm.xlu1 %952, %v275_v13   ;;  %329 = vperm.xlu0 %951, %v273_v14   ;;  %v287_v49 = vmin.f32 %v238_v45, 10.0  ;;  %v240_v51 = vmax.f32 %v191_v47, 0.0  ;;  %v239_v52 = vmax.f32 %v190_v48, 0.0  ;;  %v242_v57 = vmax.f32 %v193_v53, 0.0  ;;  %v194_v60 = vld [vmem:[%s1096_s18 + $0xa0] sm:$0xff]  ;;  %v197_v1 = vld [vmem:[%s1096_s18 + $0xb8] sm:$0xff] }
  0x18   : > { %v286_v50 = vmin.f32 %v237_v46, 10.0  ;;  %v241_v58 = vmax.f32 %v192_v54, 0.0  ;;  %v244_v63 = vmax.f32 %v195_v59, 0.0  ;;  %v243_v0 = vmax.f32 %v194_v60, 0.0  ;;  %v196_v2 = vld [vmem:[%s1096_s18 + $0xb0] sm:$0xff]  ;;  %v199_v7 = vld [vmem:[%s1096_s18 + $0xc8] sm:$0xff] }
  0x19   : > { %v289_v55 = vmin.f32 %v240_v51, 10.0  ;;  %v288_v56 = vmin.f32 %v239_v52, 10.0  ;;  %v291_v61 = vmin.f32 %v242_v57, 10.0  ;;  %v246_v5 = vmax.f32 %v197_v1, 0.0  ;;  %v198_v8 = vld [vmem:[%s1096_s18 + $0xc0] sm:$0xff]  ;;  %v201_v13 = vld [vmem:[%s1096_s18 + $0xd8] sm:$0xff] }
  0x1a   : > { %v290_v62 = vmin.f32 %v241_v58, 10.0  ;;  %v293_v3 = vmin.f32 %v244_v63, 10.0  ;;  %v292_v4 = vmin.f32 %v243_v0, 10.0  ;;  %v245_v6 = vmax.f32 %v196_v2, 0.0  ;;  %v200_v14 = vld [vmem:[%s1096_s18 + $0xd0] sm:$0xff] }
  0x1b   : > { %349 = vperm.xlu1 %952, %v277_v19   ;;  %344 = vperm.xlu0 %951, %v276_v20   ;;  %v295_v9 = vmin.f32 %v246_v5, 10.0  ;;  %v248_v11 = vmax.f32 %v199_v7, 0.0  ;;  %v247_v12 = vmax.f32 %v198_v8, 0.0  ;;  %v250_v17 = vmax.f32 %v201_v13, 0.0  ;;  %v203_v19 = vld [vmem:[%s1096_s18 + $0xe8] sm:$0xff]  ;;  %v202_v20 = vld [vmem:[%s1096_s18 + $0xe0] sm:$0xff] }
  0x1c   : > { %v294_v10 = vmin.f32 %v245_v6, 10.0  ;;  %v249_v18 = vmax.f32 %v200_v14, 0.0  ;;  %v252_v23 = vmax.f32 %v203_v19, 0.0  ;;  %v251_v24 = vmax.f32 %v202_v20, 0.0  ;;  %v1150_v20 = vld [vmem:[%s1364_s1] ss:$0 sm:$0xff] }
  0x1d   : > { %v297_v15 = vmin.f32 %v248_v11, 10.0  ;;  %v296_v16 = vmin.f32 %v247_v12, 10.0  ;;  %v299_v21 = vmin.f32 %v250_v17, 10.0 }
  0x1e   : > { %v298_v22 = vmin.f32 %v249_v18, 10.0  ;;  %v301_v27 = vmin.f32 %v252_v23, 10.0  ;;  %v300_v28 = vmin.f32 %v251_v24, 10.0 }
  0x1f   : > { %359 = vperm.xlu1 %952, %v279_v25   ;;  %354 = vperm.xlu0 %951, %v278_v26   ;;  %v205_v25 = vld [vmem:[%s1096_s18 + $0xf8] sm:$0xff]  ;;  %v204_v26 = vld [vmem:[%s1096_s18 + $0xf0] sm:$0xff] }
  0x20   : > { %v254_v29 = vmax.f32 %v205_v25, 0.0  ;;  %v253_v30 = vmax.f32 %v204_v26, 0.0 }
  0x22   : > { %v303_v33 = vmin.f32 %v254_v29, 10.0  ;;  %v302_v34 = vmin.f32 %v253_v30, 10.0 }
  0x23   : > { %369 = vperm.xlu1 %952, %v281_v31   ;;  %364 = vperm.xlu0 %951, %v280_v32   ;;  %v207_v31 = vld [vmem:[%s1096_s18 + $0x108] sm:$0xff]  ;;  %v206_v32 = vld [vmem:[%s1096_s18 + $0x100] sm:$0xff] }
  0x24   : > { %v256_v35 = vmax.f32 %v207_v31, 0.0  ;;  %v255_v36 = vmax.f32 %v206_v32, 0.0 }
  0x26   : > { %v305_v39 = vmin.f32 %v256_v35, 10.0  ;;  %v304_v40 = vmin.f32 %v255_v36, 10.0 }
  0x27   : > { %379 = vperm.xlu1 %952, %v283_v37   ;;  %374 = vperm.xlu0 %951, %v282_v38   ;;  %v209_v37 = vld [vmem:[%s1096_s18 + $0x118] sm:$0xff]  ;;  %v208_v38 = vld [vmem:[%s1096_s18 + $0x110] sm:$0xff] }
  0x28   : > { %v258_v41 = vmax.f32 %v209_v37, 0.0  ;;  %v257_v42 = vmax.f32 %v208_v38, 0.0 }
  0x2a   : > { %v307_v45 = vmin.f32 %v258_v41, 10.0  ;;  %v306_v46 = vmin.f32 %v257_v42, 10.0 }
  0x2b   : > { %389 = vperm.xlu1 %952, %v285_v43   ;;  %384 = vperm.xlu0 %951, %v284_v44   ;;  %v211_v43 = vld [vmem:[%s1096_s18 + $0x128] sm:$0xff]  ;;  %v210_v44 = vld [vmem:[%s1096_s18 + $0x120] sm:$0xff] }
  0x2c   : > { %v260_v47 = vmax.f32 %v211_v43, 0.0  ;;  %v259_v48 = vmax.f32 %v210_v44, 0.0 }
  0x2e   : > { %v309_v51 = vmin.f32 %v260_v47, 10.0  ;;  %v308_v52 = vmin.f32 %v259_v48, 10.0 }
  0x2f   : > { %399 = vperm.xlu1 %952, %v287_v49   ;;  %394 = vperm.xlu0 %951, %v286_v50   ;;  %v213_v49 = vld [vmem:[%s1096_s18 + $0x138] sm:$0xff]  ;;  %v212_v50 = vld [vmem:[%s1096_s18 + $0x130] sm:$0xff] }
  0x30   : > { %v262_v53 = vmax.f32 %v213_v49, 0.0  ;;  %v261_v54 = vmax.f32 %v212_v50, 0.0 }
  0x32   : > { %v311_v57 = vmin.f32 %v262_v53, 10.0  ;;  %v310_v58 = vmin.f32 %v261_v54, 10.0 }
  0x33   : > { %409 = vperm.xlu1 %952, %v289_v55   ;;  %404 = vperm.xlu0 %951, %v288_v56   ;;  %v215_v55 = vld [vmem:[%s1096_s18 + $0x148] sm:$0xff]  ;;  %v214_v56 = vld [vmem:[%s1096_s18 + $0x140] sm:$0xff] }
  0x34   : > { %v264_v59 = vmax.f32 %v215_v55, 0.0  ;;  %v263_v60 = vmax.f32 %v214_v56, 0.0 }
  0x36   : > { %v313_v63 = vmin.f32 %v264_v59, 10.0  ;;  %v312_v0 = vmin.f32 %v263_v60, 10.0 }
  0x37   : > { %419 = vperm.xlu1 %952, %v291_v61   ;;  %414 = vperm.xlu0 %951, %v290_v62   ;;  %v217_v61 = vld [vmem:[%s1096_s18 + $0x158] sm:$0xff]  ;;  %v216_v62 = vld [vmem:[%s1096_s18 + $0x150] sm:$0xff] }
  0x38   : > { %v266_v1 = vmax.f32 %v217_v61, 0.0  ;;  %v265_v2 = vmax.f32 %v216_v62, 0.0 }
  0x3a   : > { %v315_v5 = vmin.f32 %v266_v1, 10.0  ;;  %v314_v6 = vmin.f32 %v265_v2, 10.0 }
  0x3b   : > { %429 = vperm.xlu1 %952, %v293_v3   ;;  %424 = vperm.xlu0 %951, %v292_v4   ;;  %v219_v3 = vld [vmem:[%s1096_s18 + $0x168] sm:$0xff]  ;;  %v218_v4 = vld [vmem:[%s1096_s18 + $0x160] sm:$0xff] }
  0x3c   : > { %v268_v7 = vmax.f32 %v219_v3, 0.0  ;;  %v267_v8 = vmax.f32 %v218_v4, 0.0 }
  0x3e   : > { %v317_v11 = vmin.f32 %v268_v7, 10.0  ;;  %v316_v12 = vmin.f32 %v267_v8, 10.0 }
  0x3f   : > { %439 = vperm.xlu1 %952, %v295_v9   ;;  %434 = vperm.xlu0 %951, %v294_v10   ;;  %v221_v9 = vld [vmem:[%s1096_s18 + $0x178] sm:$0xff]  ;;  %v220_v10 = vld [vmem:[%s1096_s18 + $0x170] sm:$0xff] }
  0x40   : > { %v270_v13 = vmax.f32 %v221_v9, 0.0  ;;  %v269_v14 = vmax.f32 %v220_v10, 0.0 }
  0x42   : > { %v318_v17 = vmin.f32 %v269_v14, 10.0 }
  0x43   : > { %449 = vperm.xlu1 %952, %v297_v15   ;;  %444 = vperm.xlu0 %951, %v296_v16   ;;  %v222_v15 = vld [vmem:[%s1096_s18 + $0x180] sm:$0xff]  ;;  %v319_v16 = vmin.f32 %v270_v13, 10.0 }
  0x44   : > { %v271_v18 = vmax.f32 %v222_v15, 0.0 }
  0x46   : > { %v320_v19 = vmin.f32 %v271_v18, 10.0 }
  0x47   : > { %459 = vperm.xlu1 %952, %v299_v21   ;;  %454 = vperm.xlu0 %951, %v298_v22   ;;  %v1155_v21 = vld [vmem:[%s1365_s2] ss:$0 sm:$0xff] }
  0x4b   : > { %469 = vperm.xlu1 %952, %v301_v27   ;;  %464 = vperm.xlu0 %951, %v300_v28  }
  0x4f   : > { %479 = vperm.xlu1 %952, %v303_v33   ;;  %474 = vperm.xlu0 %951, %v302_v34  }
  0x53   : > { %489 = vperm.xlu1 %952, %v305_v39   ;;  %484 = vperm.xlu0 %951, %v304_v40  }
  0x57   : > { %499 = vperm.xlu1 %952, %v307_v45   ;;  %494 = vperm.xlu0 %951, %v306_v46  }
  0x5b   : > { %509 = vperm.xlu1 %952, %v309_v51   ;;  %504 = vperm.xlu0 %951, %v308_v52  }
  0x5f   : > { %519 = vperm.xlu1 %952, %v311_v57   ;;  %514 = vperm.xlu0 %951, %v310_v58  }
  0x63   : > { %529 = vperm.xlu1 %952, %v313_v63   ;;  %524 = vperm.xlu0 %951, %v312_v0  }
  0x67   : > { %539 = vperm.xlu1 %952, %v315_v5   ;;  %534 = vperm.xlu0 %951, %v314_v6  }
  0x6b   : > { %549 = vperm.xlu1 %952, %v317_v11   ;;  %544 = vperm.xlu0 %951, %v316_v12  }
  0x6f   : > { %559 = vperm.xlu1 %952, %v319_v16   ;;  %554 = vperm.xlu0 %951, %v318_v17  }
  0x73   : > { %564 = vperm.xlu0 %951, %v320_v19  }
  0x8e   : > { %v335_v22 = vpop.permute.xlu1 %334  ;;  %v325_v23 = vpop.permute.xlu0 %324 }
  0x8f   : > { %v575_v24 = vsub.f32 %v335_v22, %v1150_v20  ;;  %v573_v25 = vsub.f32 %v325_v23, %v1150_v20 }
  0x91   : > { %v631_v26 = vmul.f32 %v1155_v21, %v575_v24  ;;  %v629_v27 = vmul.f32 %v1155_v21, %v573_v25 }
  0x92   : > { %v340_v28 = vpop.permute.xlu1 %339  ;;  %v330_v29 = vpop.permute.xlu0 %329 }
  0x93   : > { %v680_v30 = vmul.f32 %v631_v26, %v575_v24  ;;  %v678_v31 = vmul.f32 %v629_v27, %v573_v25  ;;  %v576_v32 = vsub.f32 %v340_v28, %v1150_v20  ;;  %v574_v33 = vsub.f32 %v330_v29, %v1150_v20 }
  0x95   : > { %v731_v34 = vmul.f32 1.442695, %v680_v30  ;;  %v727_v35 = vmul.f32 1.442695, %v678_v31  ;;  %v632_v36 = vmul.f32 %v1155_v21, %v576_v32  ;;  %v630_v37 = vmul.f32 %v1155_v21, %v574_v33 }
  0x96   : > { %v350_v38 = vpop.permute.xlu1 %349  ;;  %v345_v39 = vpop.permute.xlu0 %344 }
  0x97   : > { %953 = vpow2.f32 %v731_v34  ;;  %v681_v40 = vmul.f32 %v632_v36, %v576_v32  ;;  %v679_v41 = vmul.f32 %v630_v37, %v574_v33  ;;  %v578_v42 = vsub.f32 %v350_v38, %v1150_v20 }
  0x98   : > { %955 = vpow2.f32 %v727_v35  ;;  %v577_v43 = vsub.f32 %v345_v39, %v1150_v20 }
  0x99   : > { %v733_v44 = vmul.f32 1.442695, %v681_v40  ;;  %v729_v45 = vmul.f32 1.442695, %v679_v41  ;;  %v634_v46 = vmul.f32 %v1155_v21, %v578_v42 }
  0x9a   : > { %v633_v47 = vmul.f32 %v1155_v21, %v577_v43  ;;  %v360_v48 = vpop.permute.xlu1 %359  ;;  %v355_v49 = vpop.permute.xlu0 %354 }
  0x9b   : > { %957 = vpow2.f32 %v733_v44  ;;  %v683_v50 = vmul.f32 %v634_v46, %v578_v42  ;;  %v580_v51 = vsub.f32 %v360_v48, %v1150_v20  ;;  %v579_v52 = vsub.f32 %v355_v49, %v1150_v20 }
  0x9c   : > { %959 = vpow2.f32 %v729_v45  ;;  %v682_v53 = vmul.f32 %v633_v47, %v577_v43 }
  0x9d   : > { %v737_v54 = vmul.f32 1.442695, %v683_v50  ;;  %v636_v55 = vmul.f32 %v1155_v21, %v580_v51  ;;  %v635_v56 = vmul.f32 %v1155_v21, %v579_v52 }
  0x9e   : > { %v735_v57 = vmul.f32 1.442695, %v682_v53  ;;  %v370_v58 = vpop.permute.xlu1 %369  ;;  %v365_v59 = vpop.permute.xlu0 %364 }
  0x9f   : > { %961 = vpow2.f32 %v737_v54  ;;  %v685_v60 = vmul.f32 %v636_v55, %v580_v51  ;;  %v684_v61 = vmul.f32 %v635_v56, %v579_v52  ;;  %v582_v62 = vsub.f32 %v370_v58, %v1150_v20 }
  0xa0   : > { %963 = vpow2.f32 %v735_v57  ;;  %v581_v63 = vsub.f32 %v365_v59, %v1150_v20 }
  0xa1   : > { %v741_v0 = vmul.f32 1.442695, %v685_v60  ;;  %v739_v1 = vmul.f32 1.442695, %v684_v61  ;;  %v638_v2 = vmul.f32 %v1155_v21, %v582_v62 }
  0xa2   : > { %v637_v3 = vmul.f32 %v1155_v21, %v581_v63  ;;  %v380_v4 = vpop.permute.xlu1 %379  ;;  %v375_v5 = vpop.permute.xlu0 %374 }
  0xa3   : > { %965 = vpow2.f32 %v741_v0  ;;  %v687_v6 = vmul.f32 %v638_v2, %v582_v62  ;;  %v584_v7 = vsub.f32 %v380_v4, %v1150_v20  ;;  %v583_v8 = vsub.f32 %v375_v5, %v1150_v20 }
  0xa4   : > { %v954_v9 = vpop.eup %953  ;;  %967 = vpow2.f32 %v739_v1  ;;  %v686_v10 = vmul.f32 %v637_v3, %v581_v63 }
  0xa5   : > { %v956_v11 = vpop.eup %955  ;;  %828 = vst.msk [vmem:[%s1182_s25 + $0x10] sm:$0xff] %vm825_vm0, %v954_v9  ;;  %v745_v12 = vmul.f32 1.442695, %v687_v6  ;;  %v640_v13 = vmul.f32 %v1155_v21, %v584_v7  ;;  %v639_v14 = vmul.f32 %v1155_v21, %v583_v8 }
  0xa6   : > { %826 = vst.msk [vmem:[%s1182_s25] sm:$0xff] %vm825_vm0, %v956_v11  ;;  %v743_v15 = vmul.f32 1.442695, %v686_v10  ;;  %v390_v16 = vpop.permute.xlu1 %389  ;;  %v385_v17 = vpop.permute.xlu0 %384 }
  0xa7   : > { %969 = vpow2.f32 %v745_v12  ;;  %v689_v18 = vmul.f32 %v640_v13, %v584_v7  ;;  %v688_v19 = vmul.f32 %v639_v14, %v583_v8  ;;  %v586_v22 = vsub.f32 %v390_v16, %v1150_v20 }
  0xa8   : > { %v958_v23 = vpop.eup %957  ;;  %971 = vpow2.f32 %v743_v15  ;;  %v585_v24 = vsub.f32 %v385_v17, %v1150_v20 }
  0xa9   : > { %v960_v25 = vpop.eup %959  ;;  %829 = vst.msk [vmem:[%s1182_s25 + $0x18] sm:$0xff] %vm825_vm0, %v958_v23  ;;  %v749_v26 = vmul.f32 1.442695, %v689_v18  ;;  %v747_v27 = vmul.f32 1.442695, %v688_v19  ;;  %v642_v28 = vmul.f32 %v1155_v21, %v586_v22 }
  0xaa   : > { %827 = vst.msk [vmem:[%s1182_s25 + $0x8] sm:$0xff] %vm825_vm0, %v960_v25  ;;  %v641_v29 = vmul.f32 %v1155_v21, %v585_v24  ;;  %v400_v30 = vpop.permute.xlu1 %399  ;;  %v395_v31 = vpop.permute.xlu0 %394 }
  0xab   : > { %973 = vpow2.f32 %v749_v26  ;;  %v691_v32 = vmul.f32 %v642_v28, %v586_v22  ;;  %v588_v33 = vsub.f32 %v400_v30, %v1150_v20  ;;  %v587_v34 = vsub.f32 %v395_v31, %v1150_v20 }
  0xac   : > { %v962_v35 = vpop.eup %961  ;;  %975 = vpow2.f32 %v747_v27  ;;  %v690_v36 = vmul.f32 %v641_v29, %v585_v24 }
  0xad   : > { %v964_v37 = vpop.eup %963  ;;  %831 = vst.msk [vmem:[%s1182_s25 + $0x28] sm:$0xff] %vm825_vm0, %v962_v35  ;;  %v753_v38 = vmul.f32 1.442695, %v691_v32  ;;  %v644_v39 = vmul.f32 %v1155_v21, %v588_v33  ;;  %v643_v40 = vmul.f32 %v1155_v21, %v587_v34 }
  0xae   : > { %830 = vst.msk [vmem:[%s1182_s25 + $0x20] sm:$0xff] %vm825_vm0, %v964_v37  ;;  %v751_v41 = vmul.f32 1.442695, %v690_v36  ;;  %v410_v42 = vpop.permute.xlu1 %409  ;;  %v405_v43 = vpop.permute.xlu0 %404 }
  0xaf   : > { %977 = vpow2.f32 %v753_v38  ;;  %v693_v44 = vmul.f32 %v644_v39, %v588_v33  ;;  %v692_v45 = vmul.f32 %v643_v40, %v587_v34  ;;  %v590_v46 = vsub.f32 %v410_v42, %v1150_v20 }
  0xb0   : > { %v966_v47 = vpop.eup %965  ;;  %979 = vpow2.f32 %v751_v41  ;;  %v589_v48 = vsub.f32 %v405_v43, %v1150_v20 }
  0xb1   : > { %v968_v49 = vpop.eup %967  ;;  %833 = vst.msk [vmem:[%s1182_s25 + $0x38] sm:$0xff] %vm825_vm0, %v966_v47  ;;  %v757_v50 = vmul.f32 1.442695, %v693_v44  ;;  %v755_v51 = vmul.f32 1.442695, %v692_v45  ;;  %v646_v52 = vmul.f32 %v1155_v21, %v590_v46 }
  0xb2   : > { %832 = vst.msk [vmem:[%s1182_s25 + $0x30] sm:$0xff] %vm825_vm0, %v968_v49  ;;  %v645_v53 = vmul.f32 %v1155_v21, %v589_v48  ;;  %v420_v54 = vpop.permute.xlu1 %419  ;;  %v415_v55 = vpop.permute.xlu0 %414 }
  0xb3   : > { %981 = vpow2.f32 %v757_v50  ;;  %v695_v56 = vmul.f32 %v646_v52, %v590_v46  ;;  %v592_v57 = vsub.f32 %v420_v54, %v1150_v20  ;;  %v591_v58 = vsub.f32 %v415_v55, %v1150_v20 }
  0xb4   : > { %v970_v59 = vpop.eup %969  ;;  %983 = vpow2.f32 %v755_v51  ;;  %v694_v60 = vmul.f32 %v645_v53, %v589_v48 }
  0xb5   : > { %v972_v61 = vpop.eup %971  ;;  %835 = vst.msk [vmem:[%s1182_s25 + $0x48] sm:$0xff] %vm825_vm0, %v970_v59  ;;  %v761_v62 = vmul.f32 1.442695, %v695_v56  ;;  %v648_v63 = vmul.f32 %v1155_v21, %v592_v57  ;;  %v647_v0 = vmul.f32 %v1155_v21, %v591_v58 }
  0xb6   : > { %834 = vst.msk [vmem:[%s1182_s25 + $0x40] sm:$0xff] %vm825_vm0, %v972_v61  ;;  %v759_v1 = vmul.f32 1.442695, %v694_v60  ;;  %v430_v2 = vpop.permute.xlu1 %429  ;;  %v425_v3 = vpop.permute.xlu0 %424 }
  0xb7   : > { %985 = vpow2.f32 %v761_v62  ;;  %v697_v4 = vmul.f32 %v648_v63, %v592_v57  ;;  %v696_v5 = vmul.f32 %v647_v0, %v591_v58  ;;  %v594_v6 = vsub.f32 %v430_v2, %v1150_v20 }
  0xb8   : > { %v974_v7 = vpop.eup %973  ;;  %987 = vpow2.f32 %v759_v1  ;;  %v593_v8 = vsub.f32 %v425_v3, %v1150_v20 }
  0xb9   : > { %v976_v9 = vpop.eup %975  ;;  %837 = vst.msk [vmem:[%s1182_s25 + $0x58] sm:$0xff] %vm825_vm0, %v974_v7  ;;  %v765_v10 = vmul.f32 1.442695, %v697_v4  ;;  %v763_v11 = vmul.f32 1.442695, %v696_v5  ;;  %v650_v12 = vmul.f32 %v1155_v21, %v594_v6 }
  0xba   : > { %836 = vst.msk [vmem:[%s1182_s25 + $0x50] sm:$0xff] %vm825_vm0, %v976_v9  ;;  %v649_v13 = vmul.f32 %v1155_v21, %v593_v8  ;;  %v440_v14 = vpop.permute.xlu1 %439  ;;  %v435_v15 = vpop.permute.xlu0 %434 }
  0xbb   : > { %989 = vpow2.f32 %v765_v10  ;;  %v699_v16 = vmul.f32 %v650_v12, %v594_v6  ;;  %v596_v17 = vsub.f32 %v440_v14, %v1150_v20  ;;  %v595_v18 = vsub.f32 %v435_v15, %v1150_v20 }
  0xbc   : > { %v978_v19 = vpop.eup %977  ;;  %991 = vpow2.f32 %v763_v11  ;;  %v698_v22 = vmul.f32 %v649_v13, %v593_v8 }
  0xbd   : > { %v980_v23 = vpop.eup %979  ;;  %839 = vst.msk [vmem:[%s1182_s25 + $0x68] sm:$0xff] %vm825_vm0, %v978_v19  ;;  %v769_v24 = vmul.f32 1.442695, %v699_v16  ;;  %v652_v25 = vmul.f32 %v1155_v21, %v596_v17  ;;  %v651_v26 = vmul.f32 %v1155_v21, %v595_v18 }
  0xbe   : > { %838 = vst.msk [vmem:[%s1182_s25 + $0x60] sm:$0xff] %vm825_vm0, %v980_v23  ;;  %v767_v27 = vmul.f32 1.442695, %v698_v22  ;;  %v450_v28 = vpop.permute.xlu1 %449  ;;  %v445_v29 = vpop.permute.xlu0 %444 }
  0xbf   : > { %993 = vpow2.f32 %v769_v24  ;;  %v701_v30 = vmul.f32 %v652_v25, %v596_v17  ;;  %v700_v31 = vmul.f32 %v651_v26, %v595_v18  ;;  %v598_v32 = vsub.f32 %v450_v28, %v1150_v20 }
  0xc0   : > { %v982_v33 = vpop.eup %981  ;;  %995 = vpow2.f32 %v767_v27  ;;  %v597_v34 = vsub.f32 %v445_v29, %v1150_v20 }
  0xc1   : > { %v984_v35 = vpop.eup %983  ;;  %841 = vst.msk [vmem:[%s1182_s25 + $0x78] sm:$0xff] %vm825_vm0, %v982_v33  ;;  %v773_v36 = vmul.f32 1.442695, %v701_v30  ;;  %v771_v37 = vmul.f32 1.442695, %v700_v31  ;;  %v654_v38 = vmul.f32 %v1155_v21, %v598_v32 }
  0xc2   : > { %840 = vst.msk [vmem:[%s1182_s25 + $0x70] sm:$0xff] %vm825_vm0, %v984_v35  ;;  %v653_v39 = vmul.f32 %v1155_v21, %v597_v34  ;;  %v460_v40 = vpop.permute.xlu1 %459  ;;  %v455_v41 = vpop.permute.xlu0 %454 }
  0xc3   : > { %997 = vpow2.f32 %v773_v36  ;;  %v703_v42 = vmul.f32 %v654_v38, %v598_v32  ;;  %v600_v43 = vsub.f32 %v460_v40, %v1150_v20  ;;  %v599_v44 = vsub.f32 %v455_v41, %v1150_v20 }
  0xc4   : > { %v986_v45 = vpop.eup %985  ;;  %999 = vpow2.f32 %v771_v37  ;;  %v702_v46 = vmul.f32 %v653_v39, %v597_v34 }
  0xc5   : > { %v988_v47 = vpop.eup %987  ;;  %843 = vst.msk [vmem:[%s1182_s25 + $0x88] sm:$0xff] %vm825_vm0, %v986_v45  ;;  %v777_v48 = vmul.f32 1.442695, %v703_v42  ;;  %v656_v49 = vmul.f32 %v1155_v21, %v600_v43  ;;  %v655_v50 = vmul.f32 %v1155_v21, %v599_v44 }
  0xc6   : > { %842 = vst.msk [vmem:[%s1182_s25 + $0x80] sm:$0xff] %vm825_vm0, %v988_v47  ;;  %v775_v51 = vmul.f32 1.442695, %v702_v46  ;;  %v470_v52 = vpop.permute.xlu1 %469  ;;  %v465_v53 = vpop.permute.xlu0 %464 }
  0xc7   : > { %1001 = vpow2.f32 %v777_v48  ;;  %v705_v54 = vmul.f32 %v656_v49, %v600_v43  ;;  %v704_v55 = vmul.f32 %v655_v50, %v599_v44  ;;  %v602_v56 = vsub.f32 %v470_v52, %v1150_v20 }
  0xc8   : > { %v990_v57 = vpop.eup %989  ;;  %1003 = vpow2.f32 %v775_v51  ;;  %v601_v58 = vsub.f32 %v465_v53, %v1150_v20 }
  0xc9   : > { %v992_v59 = vpop.eup %991  ;;  %845 = vst.msk [vmem:[%s1182_s25 + $0x98] sm:$0xff] %vm825_vm0, %v990_v57  ;;  %v781_v60 = vmul.f32 1.442695, %v705_v54  ;;  %v779_v61 = vmul.f32 1.442695, %v704_v55  ;;  %v658_v62 = vmul.f32 %v1155_v21, %v602_v56 }
  0xca   : > { %844 = vst.msk [vmem:[%s1182_s25 + $0x90] sm:$0xff] %vm825_vm0, %v992_v59  ;;  %v657_v63 = vmul.f32 %v1155_v21, %v601_v58  ;;  %v480_v0 = vpop.permute.xlu1 %479  ;;  %v475_v1 = vpop.permute.xlu0 %474 }
  0xcb   : > { %1005 = vpow2.f32 %v781_v60  ;;  %v707_v2 = vmul.f32 %v658_v62, %v602_v56  ;;  %v604_v3 = vsub.f32 %v480_v0, %v1150_v20  ;;  %v603_v4 = vsub.f32 %v475_v1, %v1150_v20 }
  0xcc   : > { %v994_v5 = vpop.eup %993  ;;  %1007 = vpow2.f32 %v779_v61  ;;  %v706_v6 = vmul.f32 %v657_v63, %v601_v58 }
  0xcd   : > { %v996_v7 = vpop.eup %995  ;;  %847 = vst.msk [vmem:[%s1182_s25 + $0xa8] sm:$0xff] %vm825_vm0, %v994_v5  ;;  %v785_v8 = vmul.f32 1.442695, %v707_v2  ;;  %v660_v9 = vmul.f32 %v1155_v21, %v604_v3  ;;  %v659_v10 = vmul.f32 %v1155_v21, %v603_v4 }
  0xce   : > { %846 = vst.msk [vmem:[%s1182_s25 + $0xa0] sm:$0xff] %vm825_vm0, %v996_v7  ;;  %v783_v11 = vmul.f32 1.442695, %v706_v6  ;;  %v490_v12 = vpop.permute.xlu1 %489  ;;  %v485_v13 = vpop.permute.xlu0 %484 }
  0xcf   : > { %1009 = vpow2.f32 %v785_v8  ;;  %v709_v14 = vmul.f32 %v660_v9, %v604_v3  ;;  %v708_v15 = vmul.f32 %v659_v10, %v603_v4  ;;  %v606_v16 = vsub.f32 %v490_v12, %v1150_v20 }
  0xd0   : > { %v998_v17 = vpop.eup %997  ;;  %1011 = vpow2.f32 %v783_v11  ;;  %v605_v18 = vsub.f32 %v485_v13, %v1150_v20 }
  0xd1   : > { %v1000_v19 = vpop.eup %999  ;;  %849 = vst.msk [vmem:[%s1182_s25 + $0xb8] sm:$0xff] %vm825_vm0, %v998_v17  ;;  %v789_v22 = vmul.f32 1.442695, %v709_v14  ;;  %v787_v23 = vmul.f32 1.442695, %v708_v15  ;;  %v662_v24 = vmul.f32 %v1155_v21, %v606_v16 }
  0xd2   : > { %848 = vst.msk [vmem:[%s1182_s25 + $0xb0] sm:$0xff] %vm825_vm0, %v1000_v19  ;;  %v661_v25 = vmul.f32 %v1155_v21, %v605_v18  ;;  %v500_v26 = vpop.permute.xlu1 %499  ;;  %v495_v27 = vpop.permute.xlu0 %494 }
  0xd3   : > { %1013 = vpow2.f32 %v789_v22  ;;  %v711_v28 = vmul.f32 %v662_v24, %v606_v16  ;;  %v608_v29 = vsub.f32 %v500_v26, %v1150_v20  ;;  %v607_v30 = vsub.f32 %v495_v27, %v1150_v20 }
  0xd4   : > { %v1002_v31 = vpop.eup %1001  ;;  %1015 = vpow2.f32 %v787_v23  ;;  %v710_v32 = vmul.f32 %v661_v25, %v605_v18 }
  0xd5   : > { %v1004_v33 = vpop.eup %1003  ;;  %851 = vst.msk [vmem:[%s1182_s25 + $0xc8] sm:$0xff] %vm825_vm0, %v1002_v31  ;;  %v793_v34 = vmul.f32 1.442695, %v711_v28  ;;  %v664_v35 = vmul.f32 %v1155_v21, %v608_v29  ;;  %v663_v36 = vmul.f32 %v1155_v21, %v607_v30 }
  0xd6   : > { %850 = vst.msk [vmem:[%s1182_s25 + $0xc0] sm:$0xff] %vm825_vm0, %v1004_v33  ;;  %v791_v37 = vmul.f32 1.442695, %v710_v32  ;;  %v510_v38 = vpop.permute.xlu1 %509  ;;  %v505_v39 = vpop.permute.xlu0 %504 }
  0xd7   : > { %1017 = vpow2.f32 %v793_v34  ;;  %v713_v40 = vmul.f32 %v664_v35, %v608_v29  ;;  %v712_v41 = vmul.f32 %v663_v36, %v607_v30  ;;  %v610_v42 = vsub.f32 %v510_v38, %v1150_v20 }
  0xd8   : > { %v1006_v43 = vpop.eup %1005  ;;  %1019 = vpow2.f32 %v791_v37  ;;  %v609_v44 = vsub.f32 %v505_v39, %v1150_v20 }
  0xd9   : > { %v1008_v45 = vpop.eup %1007  ;;  %853 = vst.msk [vmem:[%s1182_s25 + $0xd8] sm:$0xff] %vm825_vm0, %v1006_v43  ;;  %v797_v46 = vmul.f32 1.442695, %v713_v40  ;;  %v795_v47 = vmul.f32 1.442695, %v712_v41  ;;  %v666_v48 = vmul.f32 %v1155_v21, %v610_v42 }
  0xda   : > { %852 = vst.msk [vmem:[%s1182_s25 + $0xd0] sm:$0xff] %vm825_vm0, %v1008_v45  ;;  %v665_v49 = vmul.f32 %v1155_v21, %v609_v44  ;;  %v520_v50 = vpop.permute.xlu1 %519  ;;  %v515_v51 = vpop.permute.xlu0 %514 }
  0xdb   : > { %1021 = vpow2.f32 %v797_v46  ;;  %v715_v52 = vmul.f32 %v666_v48, %v610_v42  ;;  %v612_v53 = vsub.f32 %v520_v50, %v1150_v20  ;;  %v611_v54 = vsub.f32 %v515_v51, %v1150_v20 }
  0xdc   : > { %v1010_v55 = vpop.eup %1009  ;;  %1023 = vpow2.f32 %v795_v47  ;;  %v714_v56 = vmul.f32 %v665_v49, %v609_v44 }
  0xdd   : > { %v1012_v57 = vpop.eup %1011  ;;  %855 = vst.msk [vmem:[%s1182_s25 + $0xe8] sm:$0xff] %vm825_vm0, %v1010_v55  ;;  %v801_v58 = vmul.f32 1.442695, %v715_v52  ;;  %v668_v59 = vmul.f32 %v1155_v21, %v612_v53  ;;  %v667_v60 = vmul.f32 %v1155_v21, %v611_v54 }
  0xde   : > { %854 = vst.msk [vmem:[%s1182_s25 + $0xe0] sm:$0xff] %vm825_vm0, %v1012_v57  ;;  %v799_v61 = vmul.f32 1.442695, %v714_v56  ;;  %v530_v62 = vpop.permute.xlu1 %529  ;;  %v525_v63 = vpop.permute.xlu0 %524 }
  0xdf   : > { %1025 = vpow2.f32 %v801_v58  ;;  %v717_v0 = vmul.f32 %v668_v59, %v612_v53  ;;  %v716_v1 = vmul.f32 %v667_v60, %v611_v54  ;;  %v614_v2 = vsub.f32 %v530_v62, %v1150_v20 }
  0xe0   : > { %v1014_v3 = vpop.eup %1013  ;;  %1027 = vpow2.f32 %v799_v61  ;;  %v613_v4 = vsub.f32 %v525_v63, %v1150_v20 }
  0xe1   : > { %v1016_v5 = vpop.eup %1015  ;;  %857 = vst.msk [vmem:[%s1182_s25 + $0xf8] sm:$0xff] %vm825_vm0, %v1014_v3  ;;  %v805_v6 = vmul.f32 1.442695, %v717_v0  ;;  %v803_v7 = vmul.f32 1.442695, %v716_v1  ;;  %v670_v8 = vmul.f32 %v1155_v21, %v614_v2 }
  0xe2   : > { %856 = vst.msk [vmem:[%s1182_s25 + $0xf0] sm:$0xff] %vm825_vm0, %v1016_v5  ;;  %v669_v9 = vmul.f32 %v1155_v21, %v613_v4  ;;  %v540_v10 = vpop.permute.xlu1 %539  ;;  %v535_v11 = vpop.permute.xlu0 %534 }
  0xe3   : > { %1029 = vpow2.f32 %v805_v6  ;;  %v719_v12 = vmul.f32 %v670_v8, %v614_v2  ;;  %v616_v13 = vsub.f32 %v540_v10, %v1150_v20  ;;  %v615_v14 = vsub.f32 %v535_v11, %v1150_v20 }
  0xe4   : > { %v1018_v15 = vpop.eup %1017  ;;  %1031 = vpow2.f32 %v803_v7  ;;  %v718_v16 = vmul.f32 %v669_v9, %v613_v4 }
  0xe5   : > { %v1020_v17 = vpop.eup %1019  ;;  %859 = vst.msk [vmem:[%s1182_s25 + $0x108] sm:$0xff] %vm825_vm0, %v1018_v15  ;;  %v809_v18 = vmul.f32 1.442695, %v719_v12  ;;  %v672_v19 = vmul.f32 %v1155_v21, %v616_v13  ;;  %v671_v22 = vmul.f32 %v1155_v21, %v615_v14 }
  0xe6   : > { %858 = vst.msk [vmem:[%s1182_s25 + $0x100] sm:$0xff] %vm825_vm0, %v1020_v17  ;;  %v807_v23 = vmul.f32 1.442695, %v718_v16  ;;  %v550_v24 = vpop.permute.xlu1 %549  ;;  %v545_v25 = vpop.permute.xlu0 %544 }
  0xe7   : > { %1033 = vpow2.f32 %v809_v18  ;;  %v721_v26 = vmul.f32 %v672_v19, %v616_v13  ;;  %v720_v27 = vmul.f32 %v671_v22, %v615_v14  ;;  %v618_v28 = vsub.f32 %v550_v24, %v1150_v20 }
  0xe8   : > { %v1022_v29 = vpop.eup %1021  ;;  %1035 = vpow2.f32 %v807_v23  ;;  %v617_v30 = vsub.f32 %v545_v25, %v1150_v20 }
  0xe9   : > { %v1024_v31 = vpop.eup %1023  ;;  %861 = vst.msk [vmem:[%s1182_s25 + $0x118] sm:$0xff] %vm825_vm0, %v1022_v29  ;;  %v813_v32 = vmul.f32 1.442695, %v721_v26  ;;  %v811_v33 = vmul.f32 1.442695, %v720_v27  ;;  %v674_v34 = vmul.f32 %v1155_v21, %v618_v28 }
  0xea   : > { %860 = vst.msk [vmem:[%s1182_s25 + $0x110] sm:$0xff] %vm825_vm0, %v1024_v31  ;;  %v673_v35 = vmul.f32 %v1155_v21, %v617_v30  ;;  %v560_v36 = vpop.permute.xlu1 %559  ;;  %v555_v37 = vpop.permute.xlu0 %554 }
  0xeb   : > { %1037 = vpow2.f32 %v813_v32  ;;  %v723_v38 = vmul.f32 %v674_v34, %v618_v28  ;;  %v620_v39 = vsub.f32 %v560_v36, %v1150_v20  ;;  %v619_v40 = vsub.f32 %v555_v37, %v1150_v20 }
  0xec   : > { %v1026_v41 = vpop.eup %1025  ;;  %1039 = vpow2.f32 %v811_v33  ;;  %v722_v42 = vmul.f32 %v673_v35, %v617_v30 }
  0xed   : > { %v1028_v43 = vpop.eup %1027  ;;  %863 = vst.msk [vmem:[%s1182_s25 + $0x128] sm:$0xff] %vm825_vm0, %v1026_v41  ;;  %v817_v44 = vmul.f32 1.442695, %v723_v38  ;;  %v676_v45 = vmul.f32 %v1155_v21, %v620_v39  ;;  %v675_v46 = vmul.f32 %v1155_v21, %v619_v40 }
  0xee   : > { %862 = vst.msk [vmem:[%s1182_s25 + $0x120] sm:$0xff] %vm825_vm0, %v1028_v43  ;;  %v815_v47 = vmul.f32 1.442695, %v722_v42  ;;  %v565_v48 = vpop.permute.xlu0 %564 }
  0xef   : > { %1041 = vpow2.f32 %v817_v44  ;;  %v725_v49 = vmul.f32 %v676_v45, %v620_v39  ;;  %v724_v50 = vmul.f32 %v675_v46, %v619_v40  ;;  %v621_v51 = vsub.f32 %v565_v48, %v1150_v20 }
  0xf0   : > { %v1030_v52 = vpop.eup %1029  ;;  %1043 = vpow2.f32 %v815_v47 }
  0xf1   : > { %v1032_v53 = vpop.eup %1031  ;;  %865 = vst.msk [vmem:[%s1182_s25 + $0x138] sm:$0xff] %vm825_vm0, %v1030_v52  ;;  %v821_v54 = vmul.f32 1.442695, %v725_v49  ;;  %v819_v55 = vmul.f32 1.442695, %v724_v50  ;;  %v677_v56 = vmul.f32 %v1155_v21, %v621_v51 }
  0xf2   : > { %864 = vst.msk [vmem:[%s1182_s25 + $0x130] sm:$0xff] %vm825_vm0, %v1032_v53 }
  0xf3   : > { %1045 = vpow2.f32 %v821_v54  ;;  %v726_v57 = vmul.f32 %v677_v56, %v621_v51 }
  0xf4   : > { %v1034_v58 = vpop.eup %1033  ;;  %1047 = vpow2.f32 %v819_v55 }
  0xf5   : > { %v1036_v20 = vpop.eup %1035  ;;  %867 = vst.msk [vmem:[%s1182_s25 + $0x148] sm:$0xff] %vm825_vm0, %v1034_v58  ;;  %v823_v59 = vmul.f32 1.442695, %v726_v57 }
  0xf6   : > { %866 = vst.msk [vmem:[%s1182_s25 + $0x140] sm:$0xff] %vm825_vm0, %v1036_v20 }
  0xf7   : > { %1049 = vpow2.f32 %v823_v59 }
  0xf8   : > { %v1038_v60 = vpop.eup %1037 }
  0xf9   : > { %v1040_v21 = vpop.eup %1039  ;;  %869 = vst.msk [vmem:[%s1182_s25 + $0x158] sm:$0xff] %vm825_vm0, %v1038_v60 }
  0xfa   : > { %868 = vst.msk [vmem:[%s1182_s25 + $0x150] sm:$0xff] %vm825_vm0, %v1040_v21 }
  0xfc   : > { %v1042_v61 = vpop.eup %1041 }
  0xfd   : > { %v1044_v62 = vpop.eup %1043  ;;  %871 = vst.msk [vmem:[%s1182_s25 + $0x168] sm:$0xff] %vm825_vm0, %v1042_v61 }
  0xfe   : > { %870 = vst.msk [vmem:[%s1182_s25 + $0x160] sm:$0xff] %vm825_vm0, %v1044_v62 }
 0x100   : > { %v1046_v63 = vpop.eup %1045 }
 0x101   : > { %v1048_v0 = vpop.eup %1047  ;;  %873 = vst.msk [vmem:[%s1182_s25 + $0x178] sm:$0xff] %vm825_vm0, %v1046_v63 }
 0x102   : > { %872 = vst.msk [vmem:[%s1182_s25 + $0x170] sm:$0xff] %vm825_vm0, %v1048_v0 }
 0x104   : > { %v1050_v1 = vpop.eup %1049 }
 0x105   : > { %874 = vst.msk [vmem:[%s1182_s25 + $0x180] sm:$0xff] %vm825_vm0, %v1050_v1 }
 0x106 PF: > { %s13_s12 = sadd.s32 1, %s1057_s12  }
 0x107   : > { %p10_p4 = scmp.ge.s32.totalorder %s13_s12, 4  }
 0x109   :  { %12 = sbr.rel (!%p10_p4) target bundleno = 1 (0x1), region = 62 }

</bundles_post_ra>
